<compile_context>
chip_gen: v7x
topology: tpu7x:2x2x1
jax: 0.10.0
libtpu: 0.0.40
codegen_flags: <defaults>
</compile_context>

<pallas_src>
import jax
import jax.numpy as jnp
from jax import lax
from jax.experimental import pallas as pl
from jax.experimental.pallas import tpu as pltpu


_LANE = 128          # vreg lane width
_SUBLANE = 8         # f32 sublane count
_TILE_ROWS = 2048    # (2048, 128) f32 tile = 1 MiB; 2x double-buffered in+out
                     # = 4 MiB, far below scoped VMEM on v5e/v6e/v7x.

# Signed-int32 (two's complement) views of classic 32-bit mixing constants.
_GOLDEN = -1640531527   # 0x9E3779B9
_MIX1 = -2049059477     # 0x85EBCA6B
_MIX2 = -1028477387     # 0xC2B2AE35

# Winitzki inverse-erf constants:  erfinv(x) ~ sgn(x)*sqrt(sqrt(b^2 - t/a) - b)
# with t = ln(1-x^2), b = 2/(pi*a) + t/2, a = 0.147.
_WIN_C = 4.3307467508       # 2 / (pi * 0.147)
_WIN_INV_A = 6.8027210884   # 1 / 0.147
_INV_2P24 = 1.0 / 16777216.0


def _srl(v, n):
    return lax.shift_right_logical(v, jnp.int32(n))


def _sampling_kernel(seed_ref, x_ref, o_ref):
    tile_rows, lanes = x_ref.shape
    row = lax.broadcasted_iota(jnp.int32, (tile_rows, lanes), 0)
    col = lax.broadcasted_iota(jnp.int32, (tile_rows, lanes), 1)
    # Globally unique per-element counter -> no duplicated noise across tiles
    # or across megacore-parallel cores.
    base_row = pl.program_id(0) * tile_rows
    idx = (base_row + row) * lanes + col

    # --- counter -> 24-bit uniform via murmur3-style finalizer ---------------
    h = idx * jnp.int32(_GOLDEN) + seed_ref[0]
    h = h ^ _srl(h, 16)
    h = h * jnp.int32(_MIX1)
    h = h ^ _srl(h, 13)
    h = h * jnp.int32(_MIX2)
    h = h ^ _srl(h, 16)
    u24 = _srl(h, 8).astype(jnp.float32)               # in [0, 2^24 - 1]
    u = (u24 + 0.5) * jnp.float32(_INV_2P24)            # u  in (0, 1)
    one_minus_u = (jnp.float32(16777215.5) - u24) * jnp.float32(_INV_2P24)

    # --- uniform -> standard normal (Winitzki inverse-erf, branch-free) ------
    # w = 1 - (2u-1)^2 = 4 u (1-u), built from the exact bit values so it is
    # strictly > 0 -> no log(0) / Inf in the extreme buckets.
    w = (4.0 * u) * one_minus_u
    t = jnp.log(w)                                       # EUP
    b = jnp.float32(_WIN_C) + 0.5 * t
    y = jnp.sqrt(b * b - t * jnp.float32(_WIN_INV_A)) - b   # EUP sqrt
    noise = jnp.sqrt(2.0 * y)                            # EUP sqrt
    noise = jnp.where(u < 0.5, -noise, noise)

    o_ref[...] = (x_ref[...].astype(jnp.float32) + noise).astype(o_ref.dtype)


def sampling_forward(x: jax.Array, seed: int = 0) -> jax.Array:
    """inputs + N(0, 1) noise, same shape/dtype as inputs."""
    orig_shape = x.shape
    orig_dtype = x.dtype
    n = x.size

    # Flatten to a lane-dense (rows, 128) slab; rows is a multiple of the tile
    # height so every grid step sees a full, aligned block.
    rows_needed = pl.cdiv(n, _LANE)
    if rows_needed >= _TILE_ROWS:
        tile_rows = _TILE_ROWS
    else:
        tile_rows = pl.cdiv(rows_needed, _SUBLANE) * _SUBLANE
    rows = pl.cdiv(rows_needed, tile_rows) * tile_rows
    n_pad = rows * _LANE

    x_flat = jnp.reshape(x, (-1,))
    if n_pad != n:
        # Tail padding only when n doesn't tile exactly (at most one tile).
        x_flat = jnp.pad(x_flat, (0, n_pad - n))
    x2d = jnp.reshape(x_flat, (rows, _LANE))

    grid = (rows // tile_rows,)
    seed_arr = jnp.asarray([seed], dtype=jnp.int32)

    out2d = pl.pallas_call(
        _sampling_kernel,
        out_shape=jax.ShapeDtypeStruct((rows, _LANE), orig_dtype),
        grid_spec=pltpu.PrefetchScalarGridSpec(
            num_scalar_prefetch=1,
            grid=grid,
            in_specs=[pl.BlockSpec((tile_rows, _LANE), lambda i, seed: (i, 0))],
            out_specs=pl.BlockSpec((tile_rows, _LANE), lambda i, seed: (i, 0)),
        ),
        compiler_params=pltpu.CompilerParams(
            dimension_semantics=("parallel",),
        ),
    )(seed_arr, x2d)

    out = jnp.reshape(out2d, (-1,))
    if n_pad != n:
        out = out[:n]
    return jnp.reshape(out, orig_shape)


if __name__ == "__main__":
    key = jax.random.PRNGKey(0)
    # Small NCHW input consistent with a conv-style model: (B, C, H, W).
    x = jax.random.normal(key, (2, 4, 16, 16), dtype=jnp.float32)

    y = sampling_forward(x, seed=1234)
    y = jax.block_until_ready(y)

    assert y.shape == x.shape and y.dtype == x.dtype
    assert bool(jnp.all(jnp.isfinite(y)))
    resid = y - x
    # Noise must actually be non-trivial (output differs from input).
    assert float(jnp.max(jnp.abs(resid))) > 0.0
    # Sanity: residual should look roughly standard normal.
    assert abs(float(jnp.mean(resid))) < 0.2
    assert 0.7 < float(jnp.std(resid)) < 1.3

    # Also exercise the non-tile-multiple (padding) path with a ragged shape.
    x2 = jax.random.normal(jax.random.PRNGKey(1), (3, 5, 7), dtype=jnp.float32)
    y2 = jax.block_until_ready(sampling_forward(x2, seed=7))
    assert y2.shape == x2.shape and bool(jnp.all(jnp.isfinite(y2)))
    assert float(jnp.max(jnp.abs(y2 - x2))) > 0.0

    print("KERNEL_OK")
</pallas_src>

<mosaic_0001>
module attributes {stable_mosaic.version = 11 : i64} {
  func.func @_sampling_kernel(%arg0: i32, %arg1: memref<1xi32, #tpu.memory_space<smem>>, %arg2: memref<16x128xf32, #tpu.memory_space<vmem>>, %arg3: memref<16x128xf32, #tpu.memory_space<vmem>>) attributes {dimension_semantics = [#tpu.dimension_semantics<parallel>], iteration_bounds = array<i64: 1>, scalar_prefetch = 1 : i64, scratch_operands = 0 : i64, tpu.core_type = #tpu.core_type<tc>, window_params = [{transform_indices = @transform_0, window_bounds = array<i64: 16, 128>}, {transform_indices = @transform_1, window_bounds = array<i64: 16, 128>}]} {
    %0 = tpu.iota {dimensions = array<i32: 0>} : vector<16x128xi32>
    %1 = tpu.iota {dimensions = array<i32: 1>} : vector<16x128xi32>
    %c16_i32 = arith.constant 16 : i32
    %2 = arith.muli %arg0, %c16_i32 : i32
    %3 = vector.broadcast %2 : i32 to vector<16x128xi32>
    %4 = arith.addi %3, %0 : vector<16x128xi32>
    %c128_i32 = arith.constant 128 : i32
    %5 = vector.broadcast %c128_i32 : i32 to vector<16x128xi32>
    %6 = arith.muli %4, %5 : vector<16x128xi32>
    %7 = arith.addi %6, %1 : vector<16x128xi32>
    %c-1640531527_i32 = arith.constant -1640531527 : i32
    %8 = vector.broadcast %c-1640531527_i32 : i32 to vector<16x128xi32>
    %9 = arith.muli %7, %8 : vector<16x128xi32>
    %c0 = arith.constant 0 : index
    %10 = memref.load %arg1[%c0] : memref<1xi32, #tpu.memory_space<smem>>
    %11 = vector.broadcast %10 : i32 to vector<16x128xi32>
    %12 = arith.addi %9, %11 : vector<16x128xi32>
    %c16_i32_0 = arith.constant 16 : i32
    %13 = vector.broadcast %c16_i32_0 : i32 to vector<16x128xi32>
    %14 = arith.shrui %12, %13 : vector<16x128xi32>
    %15 = arith.xori %12, %14 : vector<16x128xi32>
    %c-2049059477_i32 = arith.constant -2049059477 : i32
    %16 = vector.broadcast %c-2049059477_i32 : i32 to vector<16x128xi32>
    %17 = arith.muli %15, %16 : vector<16x128xi32>
    %c13_i32 = arith.constant 13 : i32
    %18 = vector.broadcast %c13_i32 : i32 to vector<16x128xi32>
    %19 = arith.shrui %17, %18 : vector<16x128xi32>
    %20 = arith.xori %17, %19 : vector<16x128xi32>
    %c-1028477387_i32 = arith.constant -1028477387 : i32
    %21 = vector.broadcast %c-1028477387_i32 : i32 to vector<16x128xi32>
    %22 = arith.muli %20, %21 : vector<16x128xi32>
    %c16_i32_1 = arith.constant 16 : i32
    %23 = vector.broadcast %c16_i32_1 : i32 to vector<16x128xi32>
    %24 = arith.shrui %22, %23 : vector<16x128xi32>
    %25 = arith.xori %22, %24 : vector<16x128xi32>
    %c8_i32 = arith.constant 8 : i32
    %26 = vector.broadcast %c8_i32 : i32 to vector<16x128xi32>
    %27 = arith.shrui %25, %26 : vector<16x128xi32>
    %28 = arith.sitofp %27 : vector<16x128xi32> to vector<16x128xf32>
    %cst = arith.constant 5.000000e-01 : f32
    %29 = vector.broadcast %cst : f32 to vector<16x128xf32>
    %30 = arith.addf %28, %29 : vector<16x128xf32>
    %cst_2 = arith.constant 5.96046448E-8 : f32
    %31 = vector.broadcast %cst_2 : f32 to vector<16x128xf32>
    %32 = arith.mulf %30, %31 : vector<16x128xf32>
    %cst_3 = arith.constant 0x4B800000 : f32
    %33 = vector.broadcast %cst_3 : f32 to vector<16x128xf32>
    %34 = arith.subf %33, %28 : vector<16x128xf32>
    %cst_4 = arith.constant 5.96046448E-8 : f32
    %35 = vector.broadcast %cst_4 : f32 to vector<16x128xf32>
    %36 = arith.mulf %34, %35 : vector<16x128xf32>
    %cst_5 = arith.constant 4.000000e+00 : f32
    %37 = vector.broadcast %cst_5 : f32 to vector<16x128xf32>
    %38 = arith.mulf %37, %32 : vector<16x128xf32>
    %39 = arith.mulf %38, %36 : vector<16x128xf32>
    %40 = math.log %39 : vector<16x128xf32>
    %cst_6 = arith.constant 5.000000e-01 : f32
    %41 = vector.broadcast %cst_6 : f32 to vector<16x128xf32>
    %42 = arith.mulf %41, %40 : vector<16x128xf32>
    %cst_7 = arith.constant 4.33074665 : f32
    %43 = vector.broadcast %cst_7 : f32 to vector<16x128xf32>
    %44 = arith.addf %43, %42 : vector<16x128xf32>
    %45 = arith.mulf %44, %44 : vector<16x128xf32>
    %cst_8 = arith.constant 6.80272102 : f32
    %46 = vector.broadcast %cst_8 : f32 to vector<16x128xf32>
    %47 = arith.mulf %40, %46 : vector<16x128xf32>
    %48 = arith.subf %45, %47 : vector<16x128xf32>
    %49 = math.sqrt %48 : vector<16x128xf32>
    %50 = arith.subf %49, %44 : vector<16x128xf32>
    %cst_9 = arith.constant 2.000000e+00 : f32
    %51 = vector.broadcast %cst_9 : f32 to vector<16x128xf32>
    %52 = arith.mulf %51, %50 : vector<16x128xf32>
    %53 = math.sqrt %52 : vector<16x128xf32>
    %cst_10 = arith.constant 5.000000e-01 : f32
    %54 = vector.broadcast %cst_10 : f32 to vector<16x128xf32>
    %55 = arith.cmpf olt, %32, %54 : vector<16x128xf32>
    %cst_11 = arith.constant 0.000000e+00 : f32
    %56 = vector.broadcast %cst_11 : f32 to vector<16x128xf32>
    %57 = arith.subf %56, %53 : vector<16x128xf32>
    %58 = arith.select %55, %57, %53 : vector<16x128xi1>, vector<16x128xf32>
    %c0_12 = arith.constant 0 : index
    %c0_13 = arith.constant 0 : index
    %59 = vector.load %arg2[%c0_12, %c0_13] : memref<16x128xf32, #tpu.memory_space<vmem>>, vector<16x128xf32>
    %60 = arith.addf %59, %58 : vector<16x128xf32>
    %c0_14 = arith.constant 0 : index
    %c0_15 = arith.constant 0 : index
    %61 = vector.load %arg3[%c0_14, %c0_15] : memref<16x128xf32, #tpu.memory_space<vmem>>, vector<16x128xf32>
    tpu.vector_store %arg3[%c0_14, %c0_15], %60 {strides = array<i32>} : memref<16x128xf32, #tpu.memory_space<vmem>>, vector<16x128xf32>,
    return
  }
  func.func @transform_0(%arg0: i32, %arg1: memref<1xi32, #tpu.memory_space<smem>>) -> (i32, i32) {
    %c0_i32 = arith.constant 0 : i32
    %c0_i32_0 = arith.constant 0 : i32
    return %arg0, %c0_i32 : i32, i32
  }
  func.func @transform_1(%arg0: i32, %arg1: memref<1xi32, #tpu.memory_space<smem>>) -> (i32, i32) {
    %c0_i32 = arith.constant 0 : i32
    %c0_i32_0 = arith.constant 0 : i32
    return %arg0, %c0_i32 : i32, i32
  }
}

</mosaic_0001>

<bundles_post_ra>
// kernel: tpu_custom_call.1
= control target key start
LH: loop header
LB: loop body
LE: loop exit
PB: predicated region body
PF: predicated region fallthrough
CT: control target
= control target key end

     0   :  { %8 = vsyncpa [#allocation5], 0  ;;  %s275_s0 = inlined_call_operand.<no memory space> [shape: s32[1], index: 0, kind: input, shape index: {}]   ;;  %s276_s1 = inlined_call_operand.hbm [shape: f32[16,128], index: 1, kind: input, shape index: {}]   ;;  %s277_s2 = inlined_call_operand.hbm [shape: f32[16,128], index: 2, kind: output, shape index: {}]  }
   0x1   :  { %9 = vsyncpa [#allocation6], 0  ;;  %s215_s9 = smov [#allocation4]   ;;  %s167_s13 = scalar_lea.hbm %s276_s1, 256 }
   0x2   :  { %s15_s10 = sshll.u32 %s215_s9, 4  ;;  %p168_p0 = scmp.ne.s32.totalorder %s276_s1, %s167_s13  ;;  %s16_s10 = int_to_ptr.vmem [resolvable:$true] %s15_s10 }
   0x3   :  { %p171_p1 = scmp.lt.u32.totalorder %s167_s13, %s276_s1 }
   0x5   :  { %p173_p2 = pnand %p171_p1, %p168_p0 }
   0x7   :  { %176 = shalt.err (!%p173_p2)
}
   0x8   :  { %s177_s18 = scalar_lea.vmem %s16_s10, 256  ;;  %p182_p4 = scmp.lt.s32.totalorder %s16_s10, %s16_s10 }
   0x9   :  { %p178_p3 = scmp.ne.s32.totalorder %s16_s10, %s177_s18  ;;  %p183_p5 = scmp.lt.s32.totalorder %s177_s18, %s177_s18 }
   0xb   :  { %p184_p6 = por %p183_p5, %p182_p4 }
   0xd   :  { %p185_p7 = pnand %p184_p6, %p178_p3 }
   0xf   :  { %188 = shalt.err (!%p185_p7)
}
  0x10   :  { %s216_s19 = smov 128   ;;  %s217_s20 = smov 8  }
  0x11   :  { %21 = dma.hbm_to_vmem [thread:$0]  %s276_s1, 256, %s16_s10, [#allocation5], %s216_s19, %s216_s19, %s217_s20  }
  0x12   :  { %211 = dma.done.wait [#allocation5], 256  }
  0x13   :  { %212 = vsyncadd [#allocation5], 4294967040  ;;  %v25_v0 = vlaneseq  ;;  %v41_v7 = vstv %s275_s0  ;;  %s218_s0 = smov [#allocation7]  }
  0x14   :  { %s139_s1 = sshll.u32 %s218_s0, 4  ;;  %s140_s1 = int_to_ptr.vmem [resolvable:$true] %s139_s1 }
  0x15   :  { %v26_v1 = vshrl.u32 %v25_v0, 7  ;;  %v29_v2 = vand.u32 127, %v25_v0  ;;  %s189_s25 = scalar_lea.vmem %s140_s1, 256  ;;  %p194_p9 = scmp.lt.s32.totalorder %s140_s1, %s140_s1 }
  0x16   :  { %p190_p8 = scmp.ne.s32.totalorder %s140_s1, %s189_s25  ;;  %p195_p10 = scmp.lt.s32.totalorder %s189_s25, %s189_s25 }
  0x17   :  { %v34_v3 = vmul.u32 128, %v26_v1  ;;  %v27_v4 = vadd.s32 8, %v26_v1 }
  0x18   :  { %p196_p11 = por %p195_p10, %p194_p9 }
  0x19   :  { %v36_v5 = vadd.s32 %v34_v3, %v29_v2  ;;  %v35_v6 = vmul.u32 128, %v27_v4 }
  0x1a   :  { %p197_p12 = pnand %p196_p11, %p190_p8 }
  0x1b   :  { %v38_v8 = vmul.u32 2654435769, %v36_v5  ;;  %v37_v9 = vadd.s32 %v35_v6, %v29_v2 }
  0x1d   :  { %v42_v10 = vadd.s32 %v41_v7, %v38_v8  ;;  %v39_v11 = vmul.u32 2654435769, %v37_v9 }
  0x1f   :  { %v44_v12 = vshrl.u32 %v42_v10, 16  ;;  %v43_v13 = vadd.s32 %v41_v7, %v39_v11 }
  0x21   :  { %v46_v14 = vxor.u32 %v44_v12, %v42_v10  ;;  %v45_v15 = vshrl.u32 %v43_v13, 16 }
  0x23   :  { %v48_v16 = vmul.u32 2245907819, %v46_v14  ;;  %v47_v17 = vxor.u32 %v45_v15, %v43_v13 }
  0x25   :  { %v50_v18 = vshrl.u32 %v48_v16, 13  ;;  %v49_v19 = vmul.u32 2245907819, %v47_v17 }
  0x27   :  { %v52_v20 = vxor.u32 %v50_v18, %v48_v16  ;;  %v51_v21 = vshrl.u32 %v49_v19, 13  ;;  %v128_v18 = vld [vmem:[#allocation4] sm:$0xff] }
  0x29   :  { %v54_v22 = vmul.u32 3266489909, %v52_v20  ;;  %v53_v23 = vxor.u32 %v51_v21, %v49_v19 }
  0x2b   :  { %v56_v24 = vshrl.u32 %v54_v22, 16  ;;  %v55_v25 = vmul.u32 3266489909, %v53_v23 }
  0x2d   :  { %v58_v26 = vxor.u32 %v56_v24, %v54_v22  ;;  %v57_v27 = vshrl.u32 %v55_v25, 16  ;;  %v129_v24 = vld [vmem:[#allocation4 + $0x8] sm:$0xff] }
  0x2f   :  { %v60_v28 = vshrl.u32 %v58_v26, 8  ;;  %v59_v29 = vxor.u32 %v57_v27, %v55_v25 }
  0x31   :  { %v62_v30 = vcvt.s32.f32 %v60_v28  ;;  %v61_v31 = vshrl.u32 %v59_v29, 8 }
  0x33   :  { %v64_v32 = vadd.f32 0.5, %v62_v30  ;;  %v68_v33 = vsub.f32 16777216.0, %v62_v30  ;;  %v63_v34 = vcvt.s32.f32 %v61_v31 }
  0x35   :  { %v252_v35 = vmul.f32 5.9604645e-08, %v64_v32  ;;  %v70_v36 = vmul.f32 5.9604645e-08, %v68_v33  ;;  %v65_v37 = vadd.f32 0.5, %v63_v34  ;;  %v69_v38 = vsub.f32 16777216.0, %v63_v34 }
  0x37   :  { %v72_v39 = vmul.f32 4.0, %v252_v35  ;;  %v255_v40 = vmul.f32 5.9604645e-08, %v65_v37  ;;  %v71_v41 = vmul.f32 5.9604645e-08, %v69_v38  ;;  %vm122_vm7 = vcmp.lt.f32.partialorder %v252_v35, 0.5 }
  0x39   :  { %v74_v42 = vmul.f32 %v72_v39, %v70_v36  ;;  %v73_v43 = vmul.f32 4.0, %v255_v40  ;;  %vm123_vm9 = vcmp.lt.f32.partialorder %v255_v40, 0.5 }
  0x3b   :  { %155 = vlog2.f32 %v74_v42  ;;  %v75_v44 = vmul.f32 %v73_v43, %v71_v41 }
  0x3d   :  { %157 = vlog2.f32 %v75_v44 }
  0x45   :  { %v156_v45 = vpop.eup %155 }
  0x46   :  { %v77_v46 = vmul.f32 0.6931472, %v156_v45 }
  0x47   :  { %v158_v47 = vpop.eup %157 }
  0x48   :  { %v80_v48 = vmul.f32 0.5, %v77_v46  ;;  %v79_v49 = vmul.f32 0.6931472, %v158_v47  ;;  %v86_v51 = vmul.f32 6.802721, %v77_v46 }
  0x4a   :  { %v82_v50 = vadd.f32 4.3307467, %v80_v48  ;;  %v81_v52 = vmul.f32 0.5, %v79_v49  ;;  %v87_v55 = vmul.f32 6.802721, %v79_v49 }
  0x4c   :  { %v84_v53 = vmul.f32 %v82_v50, %v82_v50  ;;  %v83_v54 = vadd.f32 4.3307467, %v81_v52 }
  0x4e   :  { %v88_v56 = vsub.f32 %v84_v53, %v86_v51  ;;  %v85_v57 = vmul.f32 %v83_v54, %v83_v54 }
  0x50   :  { %159 = vrsqrt.f32 %v88_v56  ;;  %v89_v58 = vsub.f32 %v85_v57, %v87_v55  ;;  %vm92_vm0 = vcmp.eq.f32.partialorder %v88_v56, inf  ;;  %v95_v60 = vand.u32 2147483648, %v88_v56 }
  0x51   :  { %vm94_vm1 = vcmp.eq.f32.partialorder %v88_v56, 0.0 }
  0x52   :  { %161 = vrsqrt.f32 %v89_v58  ;;  %vm99_vm2 = vcmp.eq.f32.partialorder %v89_v58, inf  ;;  %v102_v0 = vand.u32 2147483648, %v89_v58  ;;  %vm101_vm3 = vcmp.eq.f32.partialorder %v89_v58, 0.0 }
  0x5a   :  { %v160_v59 = vpop.eup %159 }
  0x5b   :  { %v91_v61 = vmul.f32 %v160_v59, %v88_v56 }
  0x5c   :  { %v162_v62 = vpop.eup %161 }
  0x5d   :  { %v93_v63 = vsel %vm92_vm0, %v88_v56, %v91_v61  ;;  %v98_v2 = vmul.f32 %v162_v62, %v89_v58 }
  0x5e   :  { %v96_v1 = vsel %vm94_vm1, %v95_v60, %v93_v63 }
  0x5f   :  { %v104_v3 = vsub.f32 %v96_v1, %v82_v50  ;;  %v100_v4 = vsel %vm99_vm2, %v89_v58, %v98_v2 }
  0x60   :  { %v103_v6 = vsel %vm101_vm3, %v102_v0, %v100_v4 }
  0x61   :  { %v106_v5 = vmul.f32 2.0, %v104_v3  ;;  %v105_v7 = vsub.f32 %v103_v6, %v83_v54 }
  0x63   :  { %163 = vrsqrt.f32 %v106_v5  ;;  %v107_v8 = vmul.f32 2.0, %v105_v7  ;;  %vm110_vm4 = vcmp.eq.f32.partialorder %v106_v5, inf  ;;  %v113_v10 = vand.u32 2147483648, %v106_v5 }
  0x64   :  { %vm112_vm5 = vcmp.eq.f32.partialorder %v106_v5, 0.0 }
  0x65   :  { %165 = vrsqrt.f32 %v107_v8  ;;  %vm117_vm6 = vcmp.eq.f32.partialorder %v107_v8, inf  ;;  %v120_v14 = vand.u32 2147483648, %v107_v8  ;;  %vm119_vm8 = vcmp.eq.f32.partialorder %v107_v8, 0.0 }
  0x6d   :  { %v164_v9 = vpop.eup %163 }
  0x6e   :  { %v109_v11 = vmul.f32 %v164_v9, %v106_v5 }
  0x6f   :  { %v166_v12 = vpop.eup %165 }
  0x70   :  { %v111_v13 = vsel %vm110_vm4, %v106_v5, %v109_v11  ;;  %v116_v16 = vmul.f32 %v166_v12, %v107_v8 }
  0x71   :  { %v114_v15 = vsel %vm112_vm5, %v113_v10, %v111_v13 }
  0x72   :  { %v124_v17 = vsub.f32 0.0, %v114_v15  ;;  %v118_v19 = vsel %vm117_vm6, %v107_v8, %v116_v16 }
  0x73   :  { %v121_v21 = vsel %vm119_vm8, %v120_v14, %v118_v19 }
  0x74   :  { %v126_v20 = vsel %vm122_vm7, %v124_v17, %v114_v15  ;;  %v125_v23 = vsub.f32 0.0, %v121_v21 }
  0x75   :  { %v130_v22 = vadd.f32 %v128_v18, %v126_v20 }
  0x76   :  { %v127_v25 = vsel %vm123_vm9, %v125_v23, %v121_v21 }
  0x77   :  { %132 = vst [vmem:[#allocation7] sm:$0xff] %v130_v22  ;;  %v131_v26 = vadd.f32 %v129_v24, %v127_v25 }
  0x79   :  { %133 = vst [vmem:[#allocation7 + $0x8] sm:$0xff] %v131_v26 }
  0x7a   :  { %200 = shalt.err (!%p197_p12)
}
  0x7b   :  { %s201_s28 = scalar_lea.hbm %s277_s2, 256 }
  0x7c   :  { %p202_p13 = scmp.ne.s32.totalorder %s277_s2, %s201_s28  ;;  %p205_p0 = scmp.lt.u32.totalorder %s201_s28, %s277_s2 }
  0x7e   :  { %p207_p1 = pnand %p205_p0, %p202_p13 }
  0x80   :  { %210 = shalt.err (!%p207_p1)
}
  0x81   :  { %145 = dma.vmem_to_hbm [thread:$0]  %s140_s1, 256, %s277_s2, [#allocation6], %s216_s19, %s216_s19, %s217_s20  }
  0x82   :  { %213 = dma.done.wait [#allocation6], 256  }
  0x83   :  { %214 = vsyncadd [#allocation6], 4294967040 }
  0x84   :  { %149 = vsyncpa [#allocation5], 1 }
  0x85   :  { %150 = vsyncpa [#allocation6], 1 }

</bundles_post_ra>
